<compile_context>
chip_gen: v7x
topology: tpu7x:2x2x1
jax: 0.10.0
libtpu: 0.0.40
codegen_flags: <defaults>
</compile_context>

<pallas_src>
import functools

import jax
import jax.numpy as jnp
from jax.experimental import pallas as pl
from jax.experimental.pallas import tpu as pltpu


def _cto_y_kernel(w_ref, b_ref, x_ref, o_ref):
    """One batch tile: o[tm, O] = relu(x[tm, C] @ w[C, O] + b[1, O])."""
    y = jnp.dot(x_ref[...], w_ref[...], preferred_element_type=jnp.float32)
    y = y + b_ref[...]                       # [1, O] broadcast over the tile rows
    o_ref[...] = jnp.maximum(y, 0.0).astype(o_ref.dtype)


def _fold_params(params, depth):
    """Collapse `depth` bias-only Linear layers (weights stored [in, out]) into one."""
    wf = params["w0"]
    bf = params["b0"]
    for i in range(1, depth):
        wf = jnp.dot(wf, params[f"w{i}"], precision=jax.lax.Precision.HIGHEST)
        bf = jnp.dot(bf, params[f"w{i}"], precision=jax.lax.Precision.HIGHEST) + params[f"b{i}"]
    return wf, bf                            # wf: [concepts, outputs], bf: [1, outputs]


def _choose_tile(batch):
    """Batch tile in rows: multiple of 128, capped at 4096 (keeps the f32 tile slab
    small), and sized for >= 2 tiles whenever the batch allows so v7x's two
    TensorCores both get work under dimension_semantics=("parallel",)."""
    b_ceil = 128 * pl.cdiv(batch, 128)
    if b_ceil <= 128:
        return 128
    tm = 128 * pl.cdiv(pl.cdiv(b_ceil, 2), 128)   # ~half the batch, rounded to 128
    return min(tm, 4096)


@functools.partial(jax.jit, static_argnames=("depth",))
def cto_y_forward(x, params, depth=3):
    """x: [B, concepts] float32 -> [B, outputs] float32 (ReLU after the last layer)."""
    B, C = x.shape
    wf, bf = _fold_params(params, depth)     # wf: [C, O], bf: [1, O]
    O = wf.shape[1]

    tm = _choose_tile(B)
    n_tiles = pl.cdiv(B, tm)

    # VMEM budget: resident weight/bias + double-buffered (x tile + out tile),
    # lane-padded to 128, plus headroom for compiler scratch.  Clamp below v7x's
    # 64 MiB physical VMEM.
    lane = 128
    c_pad = lane * pl.cdiv(C, lane)
    o_pad = lane * pl.cdiv(O, lane)
    vmem_bytes = 4 * (C * o_pad + o_pad + 2 * tm * (c_pad + o_pad)) + (4 << 20)
    vmem_bytes = min(vmem_bytes, 48 * 1024 * 1024)

    return pl.pallas_call(
        _cto_y_kernel,
        out_shape=jax.ShapeDtypeStruct((B, O), x.dtype),
        grid_spec=pltpu.PrefetchScalarGridSpec(
            num_scalar_prefetch=0,
            grid=(n_tiles,),
            in_specs=[
                pl.BlockSpec((C, O), lambda i: (0, 0)),    # folded weight, VMEM-resident
                pl.BlockSpec((1, O), lambda i: (0, 0)),    # folded bias,   VMEM-resident
                pl.BlockSpec((tm, C), lambda i: (i, 0)),   # x batch tile, natural layout
            ],
            out_specs=pl.BlockSpec((tm, O), lambda i: (i, 0)),
        ),
        compiler_params=pltpu.CompilerParams(
            dimension_semantics=("parallel",),             # shard batch tiles over TCs (v7x)
            vmem_limit_bytes=vmem_bytes,
        ),
    )(wf, bf, x)


def init_params(key, concepts, outputs, depth=3, width=16):
    """Deterministic init mimicking nn.Linear (uniform +/- 1/sqrt(fan_in)).
    Weights are stored transposed ([in, out]) so layer i computes x @ W_i + b_i."""
    params = {}
    prev = concepts
    dims = []
    for i in range(depth):
        out_dim = outputs if i == depth - 1 else width
        dims.append((prev, out_dim))
        prev = out_dim
    keys = jax.random.split(key, 2 * depth)
    for i, (fan_in, fan_out) in enumerate(dims):
        bound = 1.0 / jnp.sqrt(jnp.float32(fan_in))
        params[f"w{i}"] = jax.random.uniform(keys[2 * i], (fan_in, fan_out),
                                             minval=-bound, maxval=bound, dtype=jnp.float32)
        params[f"b{i}"] = jax.random.uniform(keys[2 * i + 1], (1, fan_out),
                                             minval=-bound, maxval=bound, dtype=jnp.float32)
    return params


def reference_forward(x, params, depth=3):
    """Unfused pure-JAX reference matching the PyTorch module (ReLU after last layer)."""
    h = x
    for i in range(depth):
        h = h @ params[f"w{i}"] + params[f"b{i}"]
    return jnp.maximum(h, 0.0)


if __name__ == "__main__":
    key = jax.random.PRNGKey(0)
    k_x, k_p = jax.random.split(key)

    # Batch large enough to exercise the 2-tile "parallel" grid (2 x 512 rows);
    # feature dims match the module's defaults (concepts=32, width=16, outputs=8).
    B, concepts, outputs, width, depth = 1024, 32, 8, 16, 3
    x = jax.random.normal(k_x, (B, concepts), dtype=jnp.float32)
    params = init_params(k_p, concepts, outputs, depth=depth, width=width)

    y = cto_y_forward(x, params, depth=depth)
    y = jax.block_until_ready(y)

    y_ref = reference_forward(x, params, depth=depth)
    assert y.shape == (B, outputs)
    # Folding the three bias-only Linears reassociates FP ops -> ~1e-6 level diffs.
    assert jnp.allclose(y, y_ref, atol=1e-5, rtol=1e-5), "mismatch vs reference"

    print("KERNEL_OK")
</pallas_src>

<mosaic_0001>
module attributes {stable_mosaic.version = 11 : i64} {
  func.func @_cto_y_kernel(%arg0: i32, %arg1: memref<32x8xf32, #tpu.memory_space<vmem>>, %arg2: memref<1x8xf32, #tpu.memory_space<vmem>>, %arg3: memref<512x32xf32, #tpu.memory_space<vmem>>, %arg4: memref<512x8xf32, #tpu.memory_space<vmem>>) attributes {dimension_semantics = [#tpu.dimension_semantics<parallel>], iteration_bounds = array<i64: 2>, scalar_prefetch = 0 : i64, scratch_operands = 0 : i64, tpu.core_type = #tpu.core_type<tc>, window_params = [{pipeline_mode = #tpu.pipeline_mode<synchronous>, transform_indices = @transform_0, window_bounds = array<i64: 32, 8>}, {pipeline_mode = #tpu.pipeline_mode<synchronous>, transform_indices = @transform_1, window_bounds = array<i64: 1, 8>}, {transform_indices = @transform_2, window_bounds = array<i64: 512, 32>}, {transform_indices = @transform_3, window_bounds = array<i64: 512, 8>}]} {
    %c0 = arith.constant 0 : index
    %c0_0 = arith.constant 0 : index
    %0 = vector.load %arg3[%c0, %c0_0] : memref<512x32xf32, #tpu.memory_space<vmem>>, vector<512x32xf32>
    %c0_1 = arith.constant 0 : index
    %c0_2 = arith.constant 0 : index
    %1 = vector.load %arg1[%c0_1, %c0_2] : memref<32x8xf32, #tpu.memory_space<vmem>>, vector<32x8xf32>
    %cst = arith.constant dense<0.000000e+00> : vector<512x8xf32>
    %2 = tpu.matmul %0, %1, %cst {dimension_numbers = #tpu.dot_dimension_numbers<[1], [0], [0], [1], [0, 0, 1, 1], [], []>} : vector<512x32xf32>, vector<32x8xf32>, vector<512x8xf32> -> vector<512x8xf32>
    %c0_3 = arith.constant 0 : index
    %c0_4 = arith.constant 0 : index
    %3 = vector.load %arg2[%c0_3, %c0_4] : memref<1x8xf32, #tpu.memory_space<vmem>>, vector<1x8xf32>
    %4 = vector.broadcast %3 : vector<1x8xf32> to vector<512x8xf32>
    %5 = arith.addf %2, %4 : vector<512x8xf32>
    %cst_5 = arith.constant 0.000000e+00 : f32
    %6 = vector.broadcast %cst_5 : f32 to vector<512x8xf32>
    %7 = arith.maximumf %5, %6 : vector<512x8xf32>
    %c0_6 = arith.constant 0 : index
    %c0_7 = arith.constant 0 : index
    %8 = vector.load %arg4[%c0_6, %c0_7] : memref<512x8xf32, #tpu.memory_space<vmem>>, vector<512x8xf32>
    tpu.vector_store %arg4[%c0_6, %c0_7], %7 {strides = array<i32>} : memref<512x8xf32, #tpu.memory_space<vmem>>, vector<512x8xf32>,
    return
  }
  func.func @transform_0(%arg0: i32) -> (i32, i32) {
    %c0_i32 = arith.constant 0 : i32
    %c0_i32_0 = arith.constant 0 : i32
    %c0_i32_1 = arith.constant 0 : i32
    return %c0_i32, %c0_i32_0 : i32, i32
  }
  func.func @transform_1(%arg0: i32) -> (i32, i32) {
    %c0_i32 = arith.constant 0 : i32
    %c0_i32_0 = arith.constant 0 : i32
    %c0_i32_1 = arith.constant 0 : i32
    return %c0_i32, %c0_i32_0 : i32, i32
  }
  func.func @transform_2(%arg0: i32) -> (i32, i32) {
    %c0_i32 = arith.constant 0 : i32
    %c0_i32_0 = arith.constant 0 : i32
    return %arg0, %c0_i32 : i32, i32
  }
  func.func @transform_3(%arg0: i32) -> (i32, i32) {
    %c0_i32 = arith.constant 0 : i32
    %c0_i32_0 = arith.constant 0 : i32
    return %arg0, %c0_i32 : i32, i32
  }
}

</mosaic_0001>

<bundles_post_ra>
// kernel: cto_y_forward.1
= control target key start
LH: loop header
LB: loop body
LE: loop exit
PB: predicated region body
PF: predicated region fallthrough
CT: control target
= control target key end

     0   :  { %s1308_s12 = smov 0   ;;  %s1673_s0 = inlined_call_operand.vmem [shape: f32[32,8], index: 0, kind: input, shape index: {}]   ;;  %s1674_s1 = inlined_call_operand.vmem [shape: f32[1,8], index: 1, kind: input, shape index: {}]   ;;  %s1675_s2 = inlined_call_operand.vmem [shape: f32[1024,32], index: 2, kind: input, shape index: {}]   ;;  %s1676_s3 = inlined_call_operand.vmem [shape: f32[1024,8], index: 3, kind: output, shape index: {}]  }
   0x1 LB: > { %s1012_s13 = sadd.s32 4294967295, %s1286_s12   ;;  %p1016_p0 = scmp.ge.s32.totalorder %s1286_s12, 1  ;;  %s1286_s12 = sphi %s1308_s12, %s13_s12  }
   0x2   : > { %p138_p1 = scmp.lt.s32.totalorder %s1286_s12, 3 }
   0x4   : > { %p139_p2 = pnand %p1016_p0, %p138_p1 }
   0x5   : > { %v238_v0 = vld [vmem:[%s1673_s0] sm:$0xff] (!%p139_p2)  ;;  %v239_v1 = vld [vmem:[%s1673_s0 + $0x8] sm:$0xff] (!%p139_p2)  ;;  %v240_v2 = vld [vmem:[%s1673_s0 + $0x10] sm:$0xff] (!%p139_p2)  ;;  %s1017_s20 = sshll.u32 (!%p139_p2), %s1012_s13, 6  ;;  %vm249_vm0 = vcmask (!%p139_p2), 261120   ;;  %vm891_vm1 = vcmask (!%p139_p2), 64512  }
   0x6   : > { %142 = sbr.rel (%p139_p2) target bundleno = 297 (0x129), region = 32  ;;  %v1260_v3 = vpack.c.bf16 (!%p139_p2), %v239_v1, %v238_v0  ;;  %v241_v4 = vld [vmem:[%s1673_s0 + $0x18] sm:$0xff] (!%p139_p2)  ;;  %p163_p3 = scmp.lt.s32.totalorder (!%p139_p2), %s1017_s20, 127 }
   0x7   : > { %v1264_v5 = vpack.c.bf16 (!%p139_p2), %v241_v4, %v240_v2 }
   0x8   : > { %1261 = vmatprep.subr.bf16.mxu0 (!%p139_p2), %v1260_v3  ;;  %1268 = vmatprep.subr.bf16.mxu1 (!%p139_p2), %v1260_v3 }
   0x9   : > { %1263 = vmatpush3.bf16.msra.mxu0 (!%p139_p2), %v1260_v3  ;;  %1270 = vmatpush3.bf16.msra.mxu1 (!%p139_p2), %v1260_v3 }
   0xa   : > { %1265 = vmatprep.subr.bf16.mxu0 (!%p139_p2), %v1264_v5  ;;  %1269 = vmatprep.subr.bf16.mxu1 (!%p139_p2), %v1264_v5 }
   0xd   : > { %s1678_s20 = smov (!%p163_p3, %s1017_s20), 127  ;;  %1267 = vmatpush3.bf16.msra.mxu0 %v1264_v5  ;;  %1271 = vmatpush3.bf16.msra.mxu1 %v1264_v5 }
   0xe   : > { %s1018_s23 = sshll.u32 %s1678_s20, 3 }
   0xf   : > { %s1336_s26 = scalar_lea.vmem %s1675_s2, %s1018_s23  ;;  %s1478_s4 = scalar_lea.vmem %s1676_s3, %s1018_s23 }
  0x10   : > { %v174_v6 = vld [vmem:[%s1336_s26] sm:$0xff]  ;;  %v175_v8 = vld [vmem:[%s1336_s26 + $0x8] sm:$0xff]  ;;  %v176_v10 = vld [vmem:[%s1336_s26 + $0x10] sm:$0xff] }
  0x11   : > { %v206_v7 = vld [vmem:[%s1336_s26 + $0x100] sm:$0xff]  ;;  %v207_v9 = vld [vmem:[%s1336_s26 + $0x108] sm:$0xff]  ;;  %1164 = vmatprep.mubr.msk.f32.mxu0 %vm249_vm0, %v174_v6  ;;  %v208_v11 = vld [vmem:[%s1336_s26 + $0x110] sm:$0xff] }
  0x12   : > { %1212 = vmatprep.mubr.msk.f32.mxu1 %vm249_vm0, %v206_v7  ;;  %1165 = vmatmul.mubr.msk.f32.vlgmr.msra.gmra.mrb[0].mxu0 %vm249_vm0, %v175_v8  ;;  %v177_v12 = vld [vmem:[%s1336_s26 + $0x18] sm:$0xff]  ;;  %v178_v14 = vld [vmem:[%s1336_s26 + $0x20] sm:$0xff]  ;;  %v179_v16 = vld [vmem:[%s1336_s26 + $0x28] sm:$0xff] }
  0x13   : > { %1213 = vmatmul.mubr.msk.f32.vlgmr.msra.gmra.mrb[0].mxu1 %vm249_vm0, %v207_v9  ;;  %1167 = vmatprep.mubr.msk.f32.mxu0 %vm249_vm0, %v176_v10  ;;  %v209_v13 = vld [vmem:[%s1336_s26 + $0x118] sm:$0xff]  ;;  %v210_v15 = vld [vmem:[%s1336_s26 + $0x120] sm:$0xff]  ;;  %v211_v17 = vld [vmem:[%s1336_s26 + $0x128] sm:$0xff] }
  0x14   : > { %1215 = vmatprep.mubr.msk.f32.mxu1 %vm249_vm0, %v208_v11  ;;  %v180_v18 = vld [vmem:[%s1336_s26 + $0x30] sm:$0xff]  ;;  %v181_v20 = vld [vmem:[%s1336_s26 + $0x38] sm:$0xff]  ;;  %v182_v22 = vld [vmem:[%s1336_s26 + $0x40] sm:$0xff] }
  0x15   : > { %v212_v19 = vld [vmem:[%s1336_s26 + $0x130] sm:$0xff]  ;;  %v213_v21 = vld [vmem:[%s1336_s26 + $0x138] sm:$0xff]  ;;  %v214_v23 = vld [vmem:[%s1336_s26 + $0x140] sm:$0xff] }
  0x16   : > { %1168 = vmatmul.mubr.msk.f32.gmra.mrb[2].mxu0 %vm249_vm0, %v177_v12  ;;  %v183_v24 = vld [vmem:[%s1336_s26 + $0x48] sm:$0xff]  ;;  %v184_v26 = vld [vmem:[%s1336_s26 + $0x50] sm:$0xff]  ;;  %v185_v28 = vld [vmem:[%s1336_s26 + $0x58] sm:$0xff] }
  0x17   : > { %1216 = vmatmul.mubr.msk.f32.gmra.mrb[2].mxu1 %vm249_vm0, %v209_v13  ;;  %1170 = vmatprep.mubr.msk.f32.mxu0 %vm249_vm0, %v178_v14  ;;  %v215_v25 = vld [vmem:[%s1336_s26 + $0x148] sm:$0xff]  ;;  %v216_v27 = vld [vmem:[%s1336_s26 + $0x150] sm:$0xff]  ;;  %v217_v29 = vld [vmem:[%s1336_s26 + $0x158] sm:$0xff] }
  0x18   : > { %1218 = vmatprep.mubr.msk.f32.mxu1 %vm249_vm0, %v210_v15  ;;  %v186_v30 = vld [vmem:[%s1336_s26 + $0x60] sm:$0xff]  ;;  %v187_v32 = vld [vmem:[%s1336_s26 + $0x68] sm:$0xff]  ;;  %v188_v34 = vld [vmem:[%s1336_s26 + $0x70] sm:$0xff] }
  0x19   : > { %v218_v31 = vld [vmem:[%s1336_s26 + $0x160] sm:$0xff]  ;;  %v219_v33 = vld [vmem:[%s1336_s26 + $0x168] sm:$0xff]  ;;  %v220_v35 = vld [vmem:[%s1336_s26 + $0x170] sm:$0xff] }
  0x1a   : > { %1171 = vmatmul.mubr.msk.f32.gmra.mrb[4].mxu0 %vm249_vm0, %v179_v16  ;;  %v189_v36 = vld [vmem:[%s1336_s26 + $0x78] sm:$0xff]  ;;  %v190_v38 = vld [vmem:[%s1336_s26 + $0x80] sm:$0xff]  ;;  %v191_v40 = vld [vmem:[%s1336_s26 + $0x88] sm:$0xff] }
  0x1b   : > { %1219 = vmatmul.mubr.msk.f32.gmra.mrb[4].mxu1 %vm249_vm0, %v211_v17  ;;  %1173 = vmatprep.mubr.msk.f32.mxu0 %vm249_vm0, %v180_v18  ;;  %v221_v37 = vld [vmem:[%s1336_s26 + $0x178] sm:$0xff]  ;;  %v222_v39 = vld [vmem:[%s1336_s26 + $0x180] sm:$0xff]  ;;  %v223_v41 = vld [vmem:[%s1336_s26 + $0x188] sm:$0xff] }
  0x1c   : > { %1221 = vmatprep.mubr.msk.f32.mxu1 %vm249_vm0, %v212_v19  ;;  %v192_v42 = vld [vmem:[%s1336_s26 + $0x90] sm:$0xff]  ;;  %v193_v44 = vld [vmem:[%s1336_s26 + $0x98] sm:$0xff]  ;;  %v194_v46 = vld [vmem:[%s1336_s26 + $0xa0] sm:$0xff] }
  0x1d   : > { %v224_v43 = vld [vmem:[%s1336_s26 + $0x190] sm:$0xff]  ;;  %v225_v45 = vld [vmem:[%s1336_s26 + $0x198] sm:$0xff]  ;;  %v226_v47 = vld [vmem:[%s1336_s26 + $0x1a0] sm:$0xff] }
  0x1e   : > { %1174 = vmatmul.mubr.msk.f32.gmra.mrb[6].mxu0 %vm249_vm0, %v181_v20  ;;  %v195_v48 = vld [vmem:[%s1336_s26 + $0xa8] sm:$0xff]  ;;  %v196_v50 = vld [vmem:[%s1336_s26 + $0xb0] sm:$0xff]  ;;  %v197_v52 = vld [vmem:[%s1336_s26 + $0xb8] sm:$0xff] }
  0x1f   : > { %1222 = vmatmul.mubr.msk.f32.gmra.mrb[6].mxu1 %vm249_vm0, %v213_v21  ;;  %1176 = vmatprep.mubr.msk.f32.mxu0 %vm249_vm0, %v182_v22  ;;  %v227_v49 = vld [vmem:[%s1336_s26 + $0x1a8] sm:$0xff]  ;;  %v228_v51 = vld [vmem:[%s1336_s26 + $0x1b0] sm:$0xff]  ;;  %v229_v53 = vld [vmem:[%s1336_s26 + $0x1b8] sm:$0xff] }
  0x20   : > { %1224 = vmatprep.mubr.msk.f32.mxu1 %vm249_vm0, %v214_v23  ;;  %v198_v54 = vld [vmem:[%s1336_s26 + $0xc0] sm:$0xff]  ;;  %v199_v56 = vld [vmem:[%s1336_s26 + $0xc8] sm:$0xff]  ;;  %v200_v58 = vld [vmem:[%s1336_s26 + $0xd0] sm:$0xff] }
  0x21   : > { %v230_v55 = vld [vmem:[%s1336_s26 + $0x1c0] sm:$0xff]  ;;  %v231_v57 = vld [vmem:[%s1336_s26 + $0x1c8] sm:$0xff]  ;;  %v232_v59 = vld [vmem:[%s1336_s26 + $0x1d0] sm:$0xff] }
  0x22   : > { %1177 = vmatmul.mubr.msk.f32.gmra.mrb[8].mxu0 %vm249_vm0, %v183_v24  ;;  %v201_v60 = vld [vmem:[%s1336_s26 + $0xd8] sm:$0xff]  ;;  %v202_v62 = vld [vmem:[%s1336_s26 + $0xe0] sm:$0xff]  ;;  %v203_v0 = vld [vmem:[%s1336_s26 + $0xe8] sm:$0xff] }
  0x23   : > { %1225 = vmatmul.mubr.msk.f32.gmra.mrb[8].mxu1 %vm249_vm0, %v215_v25  ;;  %1179 = vmatprep.mubr.msk.f32.mxu0 %vm249_vm0, %v184_v26  ;;  %v233_v61 = vld [vmem:[%s1336_s26 + $0x1d8] sm:$0xff]  ;;  %v234_v63 = vld [vmem:[%s1336_s26 + $0x1e0] sm:$0xff]  ;;  %v235_v1 = vld [vmem:[%s1336_s26 + $0x1e8] sm:$0xff] }
  0x24   : > { %1227 = vmatprep.mubr.msk.f32.mxu1 %vm249_vm0, %v216_v27  ;;  %v204_v2 = vld [vmem:[%s1336_s26 + $0xf0] sm:$0xff]  ;;  %v205_v4 = vld [vmem:[%s1336_s26 + $0xf8] sm:$0xff]  ;;  %v1469_v6 = vld [vmem:[%s1674_s1] ss:$0 sm:$0xff] }
  0x25   : > { %v236_v3 = vld [vmem:[%s1336_s26 + $0x1f0] sm:$0xff]  ;;  %v237_v5 = vld [vmem:[%s1336_s26 + $0x1f8] sm:$0xff] }
  0x26   : > { %1180 = vmatmul.mubr.msk.f32.gmra.mrb[10].mxu0 %vm249_vm0, %v185_v28 }
  0x27   : > { %1228 = vmatmul.mubr.msk.f32.gmra.mrb[10].mxu1 %vm249_vm0, %v217_v29  ;;  %1182 = vmatprep.mubr.msk.f32.mxu0 %vm249_vm0, %v186_v30 }
  0x28   : > { %1230 = vmatprep.mubr.msk.f32.mxu1 %vm249_vm0, %v218_v31 }
  0x2a   : > { %1183 = vmatmul.mubr.msk.f32.gmra.mrb[12].mxu0 %vm249_vm0, %v187_v32 }
  0x2b   : > { %1231 = vmatmul.mubr.msk.f32.gmra.mrb[12].mxu1 %vm249_vm0, %v219_v33  ;;  %1185 = vmatprep.mubr.msk.f32.mxu0 %vm249_vm0, %v188_v34 }
  0x2c   : > { %1233 = vmatprep.mubr.msk.f32.mxu1 %vm249_vm0, %v220_v35 }
  0x2e   : > { %1186 = vmatmul.mubr.msk.f32.gmra.mrb[14].mxu0 %vm249_vm0, %v189_v36 }
  0x2f   : > { %1234 = vmatmul.mubr.msk.f32.gmra.mrb[14].mxu1 %vm249_vm0, %v221_v37  ;;  %1188 = vmatprep.mubr.msk.f32.mxu0 %vm249_vm0, %v190_v38 }
  0x30   : > { %1236 = vmatprep.mubr.msk.f32.mxu1 %vm249_vm0, %v222_v39 }
  0x32   : > { %1189 = vmatmul.mubr.msk.f32.gmra.mrb[16].mxu0 %vm249_vm0, %v191_v40 }
  0x33   : > { %1237 = vmatmul.mubr.msk.f32.gmra.mrb[16].mxu1 %vm249_vm0, %v223_v41  ;;  %1191 = vmatprep.mubr.msk.f32.mxu0 %vm249_vm0, %v192_v42 }
  0x34   : > { %1239 = vmatprep.mubr.msk.f32.mxu1 %vm249_vm0, %v224_v43 }
  0x36   : > { %1192 = vmatmul.mubr.msk.f32.gmra.mrb[18].mxu0 %vm249_vm0, %v193_v44 }
  0x37   : > { %1240 = vmatmul.mubr.msk.f32.gmra.mrb[18].mxu1 %vm249_vm0, %v225_v45  ;;  %1194 = vmatprep.mubr.msk.f32.mxu0 %vm249_vm0, %v194_v46 }
  0x38   : > { %1242 = vmatprep.mubr.msk.f32.mxu1 %vm249_vm0, %v226_v47 }
  0x3a   : > { %1195 = vmatmul.mubr.msk.f32.gmra.mrb[20].mxu0 %vm249_vm0, %v195_v48 }
  0x3b   : > { %1243 = vmatmul.mubr.msk.f32.gmra.mrb[20].mxu1 %vm249_vm0, %v227_v49  ;;  %1197 = vmatprep.mubr.msk.f32.mxu0 %vm249_vm0, %v196_v50 }
  0x3c   : > { %1245 = vmatprep.mubr.msk.f32.mxu1 %vm249_vm0, %v228_v51 }
  0x3e   : > { %1198 = vmatmul.mubr.msk.f32.gmra.mrb[22].mxu0 %vm249_vm0, %v197_v52 }
  0x3f   : > { %1246 = vmatmul.mubr.msk.f32.gmra.mrb[22].mxu1 %vm249_vm0, %v229_v53  ;;  %1200 = vmatprep.mubr.msk.f32.mxu0 %vm249_vm0, %v198_v54 }
  0x40   : > { %1248 = vmatprep.mubr.msk.f32.mxu1 %vm249_vm0, %v230_v55 }
  0x42   : > { %1201 = vmatmul.mubr.msk.f32.gmra.mrb[24].mxu0 %vm249_vm0, %v199_v56 }
  0x43   : > { %1249 = vmatmul.mubr.msk.f32.gmra.mrb[24].mxu1 %vm249_vm0, %v231_v57  ;;  %1203 = vmatprep.mubr.msk.f32.mxu0 %vm249_vm0, %v200_v58 }
  0x44   : > { %1251 = vmatprep.mubr.msk.f32.mxu1 %vm249_vm0, %v232_v59 }
  0x46   : > { %1204 = vmatmul.mubr.msk.f32.gmra.mrb[26].mxu0 %vm249_vm0, %v201_v60 }
  0x47   : > { %1252 = vmatmul.mubr.msk.f32.gmra.mrb[26].mxu1 %vm249_vm0, %v233_v61  ;;  %1206 = vmatprep.mubr.msk.f32.mxu0 %vm249_vm0, %v202_v62 }
  0x48   : > { %1254 = vmatprep.mubr.msk.f32.mxu1 %vm249_vm0, %v234_v63 }
  0x4a   : > { %1207 = vmatmul.mubr.msk.f32.gmra.mrb[28].mxu0 %vm249_vm0, %v203_v0 }
  0x4b   : > { %1255 = vmatmul.mubr.msk.f32.gmra.mrb[28].mxu1 %vm249_vm0, %v235_v1  ;;  %1209 = vmatprep.mubr.msk.f32.mxu0 %vm249_vm0, %v204_v2 }
  0x4c   : > { %1257 = vmatprep.mubr.msk.f32.mxu1 %vm249_vm0, %v236_v3 }
  0x4e   : > { %1210 = vmatmul.mubr.msk.f32.gmra.mrb[30].mxu0 %vm249_vm0, %v205_v4 }
  0x4f   : > { %1258 = vmatmul.mubr.msk.f32.gmra.mrb[30].mxu1 %vm249_vm0, %v237_v5 }
  0xe5   : > { %v1166_v7 = vpop.f32.mrb[0].mxu0 }
  0xe6   : > { %v1214_v8 = vpop.f32.mrb[0].mxu1  ;;  %v514_v9 = vadd.f32 %v1166_v7, %v1469_v6  ;;  %v508_v11 = vpop.f32.mrb[1].mxu0 }
  0xe7   : > { %v674_v10 = vadd.f32 %v1214_v8, %v1469_v6  ;;  %v668_v12 = vpop.f32.mrb[1].mxu1  ;;  %v509_v13 = vadd.f32 %v1469_v6, %v508_v11 }
  0xe8   : > { %v669_v14 = vadd.f32 %v1469_v6, %v668_v12  ;;  %v828_v15 = vmax.f32 %v514_v9, 0.0 }
  0xe9   : > { %v860_v16 = vmax.f32 %v674_v10, 0.0  ;;  %v827_v17 = vmax.f32 %v509_v13, 0.0  ;;  %v1169_v19 = vpop.f32.mrb[2].mxu0 }
  0xea   : > { %v859_v18 = vmax.f32 %v669_v14, 0.0  ;;  %v1217_v20 = vpop.f32.mrb[2].mxu1  ;;  %893 = vst.msk [vmem:[%s1478_s4 + $0x8] sm:$0xff] %vm891_vm1, %v828_v15  ;;  %v524_v21 = vadd.f32 %v1169_v19, %v1469_v6  ;;  %v518_v23 = vpop.f32.mrb[3].mxu0 }
  0xeb   : > { %925 = vst.msk [vmem:[%s1478_s4 + $0x108] sm:$0xff] %vm891_vm1, %v860_v16  ;;  %v684_v22 = vadd.f32 %v1217_v20, %v1469_v6  ;;  %v678_v24 = vpop.f32.mrb[3].mxu1  ;;  %892 = vst.msk [vmem:[%s1478_s4] sm:$0xff] %vm891_vm1, %v827_v17  ;;  %v519_v25 = vadd.f32 %v1469_v6, %v518_v23 }
  0xec   : > { %924 = vst.msk [vmem:[%s1478_s4 + $0x100] sm:$0xff] %vm891_vm1, %v859_v18  ;;  %v679_v26 = vadd.f32 %v1469_v6, %v678_v24  ;;  %v830_v27 = vmax.f32 %v524_v21, 0.0 }
  0xed   : > { %v862_v28 = vmax.f32 %v684_v22, 0.0  ;;  %v829_v29 = vmax.f32 %v519_v25, 0.0  ;;  %v1172_v31 = vpop.f32.mrb[4].mxu0 }
  0xee   : > { %v861_v30 = vmax.f32 %v679_v26, 0.0  ;;  %v1220_v32 = vpop.f32.mrb[4].mxu1  ;;  %895 = vst.msk [vmem:[%s1478_s4 + $0x18] sm:$0xff] %vm891_vm1, %v830_v27  ;;  %v534_v33 = vadd.f32 %v1172_v31, %v1469_v6  ;;  %v528_v35 = vpop.f32.mrb[5].mxu0 }
  0xef   : > { %927 = vst.msk [vmem:[%s1478_s4 + $0x118] sm:$0xff] %vm891_vm1, %v862_v28  ;;  %v694_v34 = vadd.f32 %v1220_v32, %v1469_v6  ;;  %v688_v36 = vpop.f32.mrb[5].mxu1  ;;  %894 = vst.msk [vmem:[%s1478_s4 + $0x10] sm:$0xff] %vm891_vm1, %v829_v29  ;;  %v529_v37 = vadd.f32 %v1469_v6, %v528_v35 }
  0xf0   : > { %926 = vst.msk [vmem:[%s1478_s4 + $0x110] sm:$0xff] %vm891_vm1, %v861_v30  ;;  %v689_v38 = vadd.f32 %v1469_v6, %v688_v36  ;;  %v832_v39 = vmax.f32 %v534_v33, 0.0 }
  0xf1   : > { %v864_v40 = vmax.f32 %v694_v34, 0.0  ;;  %v831_v41 = vmax.f32 %v529_v37, 0.0  ;;  %v1175_v43 = vpop.f32.mrb[6].mxu0 }
  0xf2   : > { %v863_v42 = vmax.f32 %v689_v38, 0.0  ;;  %v1223_v44 = vpop.f32.mrb[6].mxu1  ;;  %897 = vst.msk [vmem:[%s1478_s4 + $0x28] sm:$0xff] %vm891_vm1, %v832_v39  ;;  %v544_v45 = vadd.f32 %v1175_v43, %v1469_v6  ;;  %v538_v47 = vpop.f32.mrb[7].mxu0 }
  0xf3   : > { %929 = vst.msk [vmem:[%s1478_s4 + $0x128] sm:$0xff] %vm891_vm1, %v864_v40  ;;  %v704_v46 = vadd.f32 %v1223_v44, %v1469_v6  ;;  %v698_v48 = vpop.f32.mrb[7].mxu1  ;;  %896 = vst.msk [vmem:[%s1478_s4 + $0x20] sm:$0xff] %vm891_vm1, %v831_v41  ;;  %v539_v49 = vadd.f32 %v1469_v6, %v538_v47 }
  0xf4   : > { %928 = vst.msk [vmem:[%s1478_s4 + $0x120] sm:$0xff] %vm891_vm1, %v863_v42  ;;  %v699_v50 = vadd.f32 %v1469_v6, %v698_v48  ;;  %v834_v51 = vmax.f32 %v544_v45, 0.0 }
  0xf5   : > { %v866_v52 = vmax.f32 %v704_v46, 0.0  ;;  %v833_v53 = vmax.f32 %v539_v49, 0.0  ;;  %v1178_v55 = vpop.f32.mrb[8].mxu0 }
  0xf6   : > { %v865_v54 = vmax.f32 %v699_v50, 0.0  ;;  %v1226_v56 = vpop.f32.mrb[8].mxu1  ;;  %899 = vst.msk [vmem:[%s1478_s4 + $0x38] sm:$0xff] %vm891_vm1, %v834_v51  ;;  %v554_v57 = vadd.f32 %v1178_v55, %v1469_v6  ;;  %v548_v59 = vpop.f32.mrb[9].mxu0 }
  0xf7   : > { %931 = vst.msk [vmem:[%s1478_s4 + $0x138] sm:$0xff] %vm891_vm1, %v866_v52  ;;  %v714_v58 = vadd.f32 %v1226_v56, %v1469_v6  ;;  %v708_v60 = vpop.f32.mrb[9].mxu1  ;;  %898 = vst.msk [vmem:[%s1478_s4 + $0x30] sm:$0xff] %vm891_vm1, %v833_v53  ;;  %v549_v61 = vadd.f32 %v1469_v6, %v548_v59 }
  0xf8   : > { %930 = vst.msk [vmem:[%s1478_s4 + $0x130] sm:$0xff] %vm891_vm1, %v865_v54  ;;  %v709_v62 = vadd.f32 %v1469_v6, %v708_v60  ;;  %v836_v63 = vmax.f32 %v554_v57, 0.0 }
  0xf9   : > { %v868_v0 = vmax.f32 %v714_v58, 0.0  ;;  %v835_v1 = vmax.f32 %v549_v61, 0.0  ;;  %v1181_v3 = vpop.f32.mrb[10].mxu0 }
  0xfa   : > { %v867_v2 = vmax.f32 %v709_v62, 0.0  ;;  %v1229_v4 = vpop.f32.mrb[10].mxu1  ;;  %901 = vst.msk [vmem:[%s1478_s4 + $0x48] sm:$0xff] %vm891_vm1, %v836_v63  ;;  %v564_v5 = vadd.f32 %v1181_v3, %v1469_v6  ;;  %v558_v8 = vpop.f32.mrb[11].mxu0 }
  0xfb   : > { %933 = vst.msk [vmem:[%s1478_s4 + $0x148] sm:$0xff] %vm891_vm1, %v868_v0  ;;  %v724_v7 = vadd.f32 %v1229_v4, %v1469_v6  ;;  %v718_v9 = vpop.f32.mrb[11].mxu1  ;;  %900 = vst.msk [vmem:[%s1478_s4 + $0x40] sm:$0xff] %vm891_vm1, %v835_v1  ;;  %v559_v10 = vadd.f32 %v1469_v6, %v558_v8 }
  0xfc   : > { %932 = vst.msk [vmem:[%s1478_s4 + $0x140] sm:$0xff] %vm891_vm1, %v867_v2  ;;  %v719_v11 = vadd.f32 %v1469_v6, %v718_v9  ;;  %v838_v12 = vmax.f32 %v564_v5, 0.0 }
  0xfd   : > { %v870_v13 = vmax.f32 %v724_v7, 0.0  ;;  %v837_v14 = vmax.f32 %v559_v10, 0.0  ;;  %v1184_v16 = vpop.f32.mrb[12].mxu0 }
  0xfe   : > { %v869_v15 = vmax.f32 %v719_v11, 0.0  ;;  %v1232_v17 = vpop.f32.mrb[12].mxu1  ;;  %903 = vst.msk [vmem:[%s1478_s4 + $0x58] sm:$0xff] %vm891_vm1, %v838_v12  ;;  %v574_v18 = vadd.f32 %v1184_v16, %v1469_v6  ;;  %v568_v20 = vpop.f32.mrb[13].mxu0 }
  0xff   : > { %935 = vst.msk [vmem:[%s1478_s4 + $0x158] sm:$0xff] %vm891_vm1, %v870_v13  ;;  %v734_v19 = vadd.f32 %v1232_v17, %v1469_v6  ;;  %v728_v21 = vpop.f32.mrb[13].mxu1  ;;  %902 = vst.msk [vmem:[%s1478_s4 + $0x50] sm:$0xff] %vm891_vm1, %v837_v14  ;;  %v569_v22 = vadd.f32 %v1469_v6, %v568_v20 }
 0x100   : > { %934 = vst.msk [vmem:[%s1478_s4 + $0x150] sm:$0xff] %vm891_vm1, %v869_v15  ;;  %v729_v23 = vadd.f32 %v1469_v6, %v728_v21  ;;  %v840_v24 = vmax.f32 %v574_v18, 0.0 }
 0x101   : > { %v872_v25 = vmax.f32 %v734_v19, 0.0  ;;  %v839_v26 = vmax.f32 %v569_v22, 0.0  ;;  %v1187_v28 = vpop.f32.mrb[14].mxu0 }
 0x102   : > { %v871_v27 = vmax.f32 %v729_v23, 0.0  ;;  %v1235_v29 = vpop.f32.mrb[14].mxu1  ;;  %905 = vst.msk [vmem:[%s1478_s4 + $0x68] sm:$0xff] %vm891_vm1, %v840_v24  ;;  %v584_v30 = vadd.f32 %v1187_v28, %v1469_v6  ;;  %v578_v32 = vpop.f32.mrb[15].mxu0 }
 0x103   : > { %937 = vst.msk [vmem:[%s1478_s4 + $0x168] sm:$0xff] %vm891_vm1, %v872_v25  ;;  %v744_v31 = vadd.f32 %v1235_v29, %v1469_v6  ;;  %v738_v33 = vpop.f32.mrb[15].mxu1  ;;  %904 = vst.msk [vmem:[%s1478_s4 + $0x60] sm:$0xff] %vm891_vm1, %v839_v26  ;;  %v579_v34 = vadd.f32 %v1469_v6, %v578_v32 }
 0x104   : > { %936 = vst.msk [vmem:[%s1478_s4 + $0x160] sm:$0xff] %vm891_vm1, %v871_v27  ;;  %v739_v35 = vadd.f32 %v1469_v6, %v738_v33  ;;  %v842_v36 = vmax.f32 %v584_v30, 0.0 }
 0x105   : > { %v874_v37 = vmax.f32 %v744_v31, 0.0  ;;  %v841_v38 = vmax.f32 %v579_v34, 0.0  ;;  %v1190_v40 = vpop.f32.mrb[16].mxu0 }
 0x106   : > { %v873_v39 = vmax.f32 %v739_v35, 0.0  ;;  %v1238_v41 = vpop.f32.mrb[16].mxu1  ;;  %907 = vst.msk [vmem:[%s1478_s4 + $0x78] sm:$0xff] %vm891_vm1, %v842_v36  ;;  %v594_v42 = vadd.f32 %v1190_v40, %v1469_v6  ;;  %v588_v44 = vpop.f32.mrb[17].mxu0 }
 0x107   : > { %939 = vst.msk [vmem:[%s1478_s4 + $0x178] sm:$0xff] %vm891_vm1, %v874_v37  ;;  %v754_v43 = vadd.f32 %v1238_v41, %v1469_v6  ;;  %v748_v45 = vpop.f32.mrb[17].mxu1  ;;  %906 = vst.msk [vmem:[%s1478_s4 + $0x70] sm:$0xff] %vm891_vm1, %v841_v38  ;;  %v589_v46 = vadd.f32 %v1469_v6, %v588_v44 }
 0x108   : > { %938 = vst.msk [vmem:[%s1478_s4 + $0x170] sm:$0xff] %vm891_vm1, %v873_v39  ;;  %v749_v47 = vadd.f32 %v1469_v6, %v748_v45  ;;  %v844_v48 = vmax.f32 %v594_v42, 0.0 }
 0x109   : > { %v876_v49 = vmax.f32 %v754_v43, 0.0  ;;  %v843_v50 = vmax.f32 %v589_v46, 0.0  ;;  %v1193_v52 = vpop.f32.mrb[18].mxu0 }
 0x10a   : > { %v875_v51 = vmax.f32 %v749_v47, 0.0  ;;  %v1241_v53 = vpop.f32.mrb[18].mxu1  ;;  %909 = vst.msk [vmem:[%s1478_s4 + $0x88] sm:$0xff] %vm891_vm1, %v844_v48  ;;  %v604_v54 = vadd.f32 %v1193_v52, %v1469_v6  ;;  %v598_v56 = vpop.f32.mrb[19].mxu0 }
 0x10b   : > { %941 = vst.msk [vmem:[%s1478_s4 + $0x188] sm:$0xff] %vm891_vm1, %v876_v49  ;;  %v764_v55 = vadd.f32 %v1241_v53, %v1469_v6  ;;  %v758_v57 = vpop.f32.mrb[19].mxu1  ;;  %908 = vst.msk [vmem:[%s1478_s4 + $0x80] sm:$0xff] %vm891_vm1, %v843_v50  ;;  %v599_v58 = vadd.f32 %v1469_v6, %v598_v56 }
 0x10c   : > { %940 = vst.msk [vmem:[%s1478_s4 + $0x180] sm:$0xff] %vm891_vm1, %v875_v51  ;;  %v759_v59 = vadd.f32 %v1469_v6, %v758_v57  ;;  %v846_v60 = vmax.f32 %v604_v54, 0.0 }
 0x10d   : > { %v878_v61 = vmax.f32 %v764_v55, 0.0  ;;  %v845_v62 = vmax.f32 %v599_v58, 0.0  ;;  %v1196_v0 = vpop.f32.mrb[20].mxu0 }
 0x10e   : > { %v877_v63 = vmax.f32 %v759_v59, 0.0  ;;  %v1244_v1 = vpop.f32.mrb[20].mxu1  ;;  %911 = vst.msk [vmem:[%s1478_s4 + $0x98] sm:$0xff] %vm891_vm1, %v846_v60  ;;  %v614_v2 = vadd.f32 %v1196_v0, %v1469_v6  ;;  %v608_v4 = vpop.f32.mrb[21].mxu0 }
 0x10f   : > { %943 = vst.msk [vmem:[%s1478_s4 + $0x198] sm:$0xff] %vm891_vm1, %v878_v61  ;;  %v774_v3 = vadd.f32 %v1244_v1, %v1469_v6  ;;  %v768_v5 = vpop.f32.mrb[21].mxu1  ;;  %910 = vst.msk [vmem:[%s1478_s4 + $0x90] sm:$0xff] %vm891_vm1, %v845_v62  ;;  %v609_v7 = vadd.f32 %v1469_v6, %v608_v4 }
 0x110   : > { %942 = vst.msk [vmem:[%s1478_s4 + $0x190] sm:$0xff] %vm891_vm1, %v877_v63  ;;  %v769_v8 = vadd.f32 %v1469_v6, %v768_v5  ;;  %v848_v9 = vmax.f32 %v614_v2, 0.0 }
 0x111   : > { %v880_v10 = vmax.f32 %v774_v3, 0.0  ;;  %v847_v11 = vmax.f32 %v609_v7, 0.0  ;;  %v1199_v13 = vpop.f32.mrb[22].mxu0 }
 0x112   : > { %v879_v12 = vmax.f32 %v769_v8, 0.0  ;;  %v1247_v14 = vpop.f32.mrb[22].mxu1  ;;  %913 = vst.msk [vmem:[%s1478_s4 + $0xa8] sm:$0xff] %vm891_vm1, %v848_v9  ;;  %v624_v15 = vadd.f32 %v1199_v13, %v1469_v6  ;;  %v618_v17 = vpop.f32.mrb[23].mxu0 }
 0x113   : > { %945 = vst.msk [vmem:[%s1478_s4 + $0x1a8] sm:$0xff] %vm891_vm1, %v880_v10  ;;  %v784_v16 = vadd.f32 %v1247_v14, %v1469_v6  ;;  %v778_v18 = vpop.f32.mrb[23].mxu1  ;;  %912 = vst.msk [vmem:[%s1478_s4 + $0xa0] sm:$0xff] %vm891_vm1, %v847_v11  ;;  %v619_v19 = vadd.f32 %v1469_v6, %v618_v17 }
 0x114   : > { %944 = vst.msk [vmem:[%s1478_s4 + $0x1a0] sm:$0xff] %vm891_vm1, %v879_v12  ;;  %v779_v20 = vadd.f32 %v1469_v6, %v778_v18  ;;  %v850_v21 = vmax.f32 %v624_v15, 0.0 }
 0x115   : > { %v882_v22 = vmax.f32 %v784_v16, 0.0  ;;  %v849_v23 = vmax.f32 %v619_v19, 0.0  ;;  %v1202_v25 = vpop.f32.mrb[24].mxu0 }
 0x116   : > { %v881_v24 = vmax.f32 %v779_v20, 0.0  ;;  %v1250_v26 = vpop.f32.mrb[24].mxu1  ;;  %915 = vst.msk [vmem:[%s1478_s4 + $0xb8] sm:$0xff] %vm891_vm1, %v850_v21  ;;  %v634_v27 = vadd.f32 %v1202_v25, %v1469_v6  ;;  %v628_v29 = vpop.f32.mrb[25].mxu0 }
 0x117   : > { %947 = vst.msk [vmem:[%s1478_s4 + $0x1b8] sm:$0xff] %vm891_vm1, %v882_v22  ;;  %v794_v28 = vadd.f32 %v1250_v26, %v1469_v6  ;;  %v788_v30 = vpop.f32.mrb[25].mxu1  ;;  %914 = vst.msk [vmem:[%s1478_s4 + $0xb0] sm:$0xff] %vm891_vm1, %v849_v23  ;;  %v629_v31 = vadd.f32 %v1469_v6, %v628_v29 }
 0x118   : > { %946 = vst.msk [vmem:[%s1478_s4 + $0x1b0] sm:$0xff] %vm891_vm1, %v881_v24  ;;  %v789_v32 = vadd.f32 %v1469_v6, %v788_v30  ;;  %v852_v33 = vmax.f32 %v634_v27, 0.0 }
 0x119   : > { %v884_v34 = vmax.f32 %v794_v28, 0.0  ;;  %v851_v35 = vmax.f32 %v629_v31, 0.0  ;;  %v1205_v37 = vpop.f32.mrb[26].mxu0 }
 0x11a   : > { %v883_v36 = vmax.f32 %v789_v32, 0.0  ;;  %v1253_v38 = vpop.f32.mrb[26].mxu1  ;;  %917 = vst.msk [vmem:[%s1478_s4 + $0xc8] sm:$0xff] %vm891_vm1, %v852_v33  ;;  %v644_v39 = vadd.f32 %v1205_v37, %v1469_v6  ;;  %v638_v41 = vpop.f32.mrb[27].mxu0 }
 0x11b   : > { %949 = vst.msk [vmem:[%s1478_s4 + $0x1c8] sm:$0xff] %vm891_vm1, %v884_v34  ;;  %v804_v40 = vadd.f32 %v1253_v38, %v1469_v6  ;;  %v798_v42 = vpop.f32.mrb[27].mxu1  ;;  %916 = vst.msk [vmem:[%s1478_s4 + $0xc0] sm:$0xff] %vm891_vm1, %v851_v35  ;;  %v639_v43 = vadd.f32 %v1469_v6, %v638_v41 }
 0x11c   : > { %948 = vst.msk [vmem:[%s1478_s4 + $0x1c0] sm:$0xff] %vm891_vm1, %v883_v36  ;;  %v799_v44 = vadd.f32 %v1469_v6, %v798_v42  ;;  %v854_v45 = vmax.f32 %v644_v39, 0.0 }
 0x11d   : > { %v886_v46 = vmax.f32 %v804_v40, 0.0  ;;  %v853_v47 = vmax.f32 %v639_v43, 0.0  ;;  %v1208_v49 = vpop.f32.mrb[28].mxu0 }
 0x11e   : > { %v885_v48 = vmax.f32 %v799_v44, 0.0  ;;  %v1256_v50 = vpop.f32.mrb[28].mxu1  ;;  %919 = vst.msk [vmem:[%s1478_s4 + $0xd8] sm:$0xff] %vm891_vm1, %v854_v45  ;;  %v654_v51 = vadd.f32 %v1208_v49, %v1469_v6  ;;  %v648_v53 = vpop.f32.mrb[29].mxu0 }
 0x11f   : > { %951 = vst.msk [vmem:[%s1478_s4 + $0x1d8] sm:$0xff] %vm891_vm1, %v886_v46  ;;  %v814_v52 = vadd.f32 %v1256_v50, %v1469_v6  ;;  %v808_v54 = vpop.f32.mrb[29].mxu1  ;;  %918 = vst.msk [vmem:[%s1478_s4 + $0xd0] sm:$0xff] %vm891_vm1, %v853_v47  ;;  %v649_v55 = vadd.f32 %v1469_v6, %v648_v53 }
 0x120   : > { %950 = vst.msk [vmem:[%s1478_s4 + $0x1d0] sm:$0xff] %vm891_vm1, %v885_v48  ;;  %v809_v56 = vadd.f32 %v1469_v6, %v808_v54  ;;  %v856_v57 = vmax.f32 %v654_v51, 0.0 }
 0x121   : > { %v888_v58 = vmax.f32 %v814_v52, 0.0  ;;  %v855_v59 = vmax.f32 %v649_v55, 0.0  ;;  %v1211_v61 = vpop.f32.mrb[30].mxu0 }
 0x122   : > { %v887_v60 = vmax.f32 %v809_v56, 0.0  ;;  %v1259_v62 = vpop.f32.mrb[30].mxu1  ;;  %921 = vst.msk [vmem:[%s1478_s4 + $0xe8] sm:$0xff] %vm891_vm1, %v856_v57  ;;  %v664_v63 = vadd.f32 %v1211_v61, %v1469_v6  ;;  %v658_v1 = vpop.f32.mrb[31].mxu0 }
 0x123   : > { %953 = vst.msk [vmem:[%s1478_s4 + $0x1e8] sm:$0xff] %vm891_vm1, %v888_v58  ;;  %v824_v0 = vadd.f32 %v1259_v62, %v1469_v6  ;;  %v818_v2 = vpop.f32.mrb[31].mxu1  ;;  %920 = vst.msk [vmem:[%s1478_s4 + $0xe0] sm:$0xff] %vm891_vm1, %v855_v59  ;;  %v659_v3 = vadd.f32 %v1469_v6, %v658_v1 }
 0x124   : > { %952 = vst.msk [vmem:[%s1478_s4 + $0x1e0] sm:$0xff] %vm891_vm1, %v887_v60  ;;  %v819_v4 = vadd.f32 %v1469_v6, %v818_v2  ;;  %v858_v5 = vmax.f32 %v664_v63, 0.0 }
 0x125   : > { %v890_v7 = vmax.f32 %v824_v0, 0.0  ;;  %v857_v8 = vmax.f32 %v659_v3, 0.0 }
 0x126   : > { %v889_v9 = vmax.f32 %v819_v4, 0.0  ;;  %923 = vst.msk [vmem:[%s1478_s4 + $0xf8] sm:$0xff] %vm891_vm1, %v858_v5 }
 0x127   : > { %955 = vst.msk [vmem:[%s1478_s4 + $0x1f8] sm:$0xff] %vm891_vm1, %v890_v7  ;;  %922 = vst.msk [vmem:[%s1478_s4 + $0xf0] sm:$0xff] %vm891_vm1, %v857_v8 }
 0x128   : > { %954 = vst.msk [vmem:[%s1478_s4 + $0x1f0] sm:$0xff] %vm891_vm1, %v889_v9 }
 0x129 PF: > { %s13_s12 = sadd.s32 1, %s1286_s12  }
 0x12a   : > { %p10_p4 = scmp.ge.s32.totalorder %s13_s12, 4  }
 0x12c   :  { %12 = sbr.rel (!%p10_p4) target bundleno = 1 (0x1), region = 62 }

</bundles_post_ra>
